<compile_context>
chip_gen: v7x
topology: tpu7x:2x2x1
jax: 0.10.0
libtpu: 0.0.40
codegen_flags: <defaults>
</compile_context>

<pallas_src>
import functools

import jax
import jax.numpy as jnp
from jax.experimental import pallas as pl
from jax.experimental.pallas import tpu as pltpu


def _round_up(x, m):
    return (x + m - 1) // m * m


def _attack_regressor_kernel(x_ref, w1_ref, b1_ref, w2_ref, b2_ref, out_ref):
    """One batch tile of: Linear -> ReLU -> Linear.

    x_ref : (TB, F)  compute dtype (bf16 or f32)
    w1_ref: (F, H)   compute dtype (pre-transposed nn.Linear weight)
    b1_ref: (1, H)   f32
    w2_ref: (H, C)   compute dtype (pre-transposed)
    b2_ref: (1, C)   f32
    out_ref:(TB, C)  f32
    """
    # Layer 1 on the MXU, f32 accumulation regardless of input dtype.
    h = jnp.dot(x_ref[...], w1_ref[...], preferred_element_type=jnp.float32)
    # Bias add + ReLU stay in f32 (v5e VPU has no bf16 path).
    h = jnp.maximum(h + b1_ref[...], 0.0)
    # Layer 2: cast activations back to the matmul dtype; accumulate in f32.
    y = jnp.dot(h.astype(w2_ref.dtype), w2_ref[...],
                preferred_element_type=jnp.float32)
    out_ref[...] = (y + b2_ref[...]).astype(out_ref.dtype)


def prepare_attack_regressor_params(w1, b1, w2, b2, *, use_bf16=True):
    """One-time parameter preparation (hoisted out of the per-call path).

    w1: [hidden, input_size]  (PyTorch nn.Linear layout)
    b1: [hidden]
    w2: [output_size, hidden]
    b2: [output_size]
    """
    compute_dtype = jnp.bfloat16 if use_bf16 else jnp.float32
    w1_t = jnp.asarray(w1).T.astype(compute_dtype)          # [F, H]
    w2_t = jnp.asarray(w2).T.astype(compute_dtype)          # [H, C]
    b1_2d = jnp.asarray(b1).reshape(1, -1).astype(jnp.float32)
    b2_2d = jnp.asarray(b2).reshape(1, -1).astype(jnp.float32)
    return w1_t, b1_2d, w2_t, b2_2d


@functools.partial(jax.jit, static_argnames=("block_b",))
def attack_regressor_forward(x, params, *, block_b=512):
    """Forward pass of AttackRegressor.

    x      : [B, input_size] float32
    params : output of prepare_attack_regressor_params
    returns: [B, output_size] float32 (raw regression output, no activation)
    """
    w1_t, b1_2d, w2_t, b2_2d = params
    B, F = x.shape
    H = w1_t.shape[1]
    C = w2_t.shape[1]
    compute_dtype = w1_t.dtype

    # Batch-tile size: big enough for pipelining, bounded for v7x's 64 MiB
    # VMEM (per-step footprint here is tiny: bf16 x tile + (TB,H) f32 h + out).
    if B >= block_b:
        tb = block_b
    else:
        tb = max(8, _round_up(B, 8))
    b_pad = _round_up(B, tb)

    x_c = x.astype(compute_dtype)
    if b_pad != B:
        x_c = jnp.pad(x_c, ((0, b_pad - B), (0, 0)))

    grid = (b_pad // tb,)

    cost = pl.CostEstimate(
        flops=2 * b_pad * (F * H + H * C),
        transcendentals=0,
        bytes_accessed=(x_c.size * x_c.dtype.itemsize
                        + w1_t.size * w1_t.dtype.itemsize
                        + w2_t.size * w2_t.dtype.itemsize
                        + (b1_2d.size + b2_2d.size) * 4
                        + b_pad * C * 4),
    )

    out = pl.pallas_call(
        _attack_regressor_kernel,
        out_shape=jax.ShapeDtypeStruct((b_pad, C), jnp.float32),
        grid_spec=pltpu.PrefetchScalarGridSpec(
            num_scalar_prefetch=0,
            grid=grid,
            in_specs=[
                pl.BlockSpec((tb, F), lambda i: (i, 0)),  # x: tiled over batch
                pl.BlockSpec((F, H), lambda i: (0, 0)),   # weights / biases
                pl.BlockSpec((1, H), lambda i: (0, 0)),   #   stay VMEM-resident
                pl.BlockSpec((H, C), lambda i: (0, 0)),   #   across all tiles
                pl.BlockSpec((1, C), lambda i: (0, 0)),
            ],
            out_specs=pl.BlockSpec((tb, C), lambda i: (i, 0)),
        ),
        compiler_params=pltpu.CompilerParams(
            dimension_semantics=("parallel",),  # shard batch tiles on v7x's 2 TCs
        ),
        cost_estimate=cost,
    )(x_c, w1_t, b1_2d, w2_t, b2_2d)

    return out[:B]


def _ref_forward_f32(x, w1, b1, w2, b2):
    h = jnp.maximum(x @ w1.T + b1, 0.0)
    return h @ w2.T + b2


def _ref_forward_bf16(x, w1, b1, w2, b2):
    cd = jnp.bfloat16
    h = jnp.dot(x.astype(cd), w1.T.astype(cd),
                preferred_element_type=jnp.float32) + b1
    h = jnp.maximum(h, 0.0)
    y = jnp.dot(h.astype(cd), w2.T.astype(cd),
                preferred_element_type=jnp.float32) + b2
    return y


if __name__ == "__main__":
    # Shapes implied by the module: input_size features, hidden=32, output=1.
    batch = 8
    input_size = 16
    hidden_size = 32
    output_size = 1

    key = jax.random.PRNGKey(0)
    kx, k1, k2, k3, k4, kx2 = jax.random.split(key, 6)

    x = jax.random.normal(kx, (batch, input_size), dtype=jnp.float32)

    # Deterministic PyTorch-Linear-style init: U(-1/sqrt(fan_in), 1/sqrt(fan_in))
    bound1 = 1.0 / jnp.sqrt(input_size)
    w1 = jax.random.uniform(k1, (hidden_size, input_size), jnp.float32, -bound1, bound1)
    b1 = jax.random.uniform(k2, (hidden_size,), jnp.float32, -bound1, bound1)
    bound2 = 1.0 / jnp.sqrt(hidden_size)
    w2 = jax.random.uniform(k3, (output_size, hidden_size), jnp.float32, -bound2, bound2)
    b2 = jax.random.uniform(k4, (output_size,), jnp.float32, -bound2, bound2)

    params = prepare_attack_regressor_params(w1, b1, w2, b2, use_bf16=True)

    # Small batch (single tile).
    out = attack_regressor_forward(x, params)
    out = jax.block_until_ready(out)
    assert out.shape == (batch, output_size)
    ref_bf16 = _ref_forward_bf16(x, w1, b1, w2, b2)
    ref_f32 = _ref_forward_f32(x, w1, b1, w2, b2)
    assert jnp.allclose(out, ref_bf16, atol=1e-4, rtol=1e-4)
    assert jnp.allclose(out, ref_f32, atol=5e-2, rtol=5e-2)

    # Larger, non-multiple batch exercises the multi-tile grid + padding path.
    big_batch = 1037
    x_big = jax.random.normal(kx2, (big_batch, input_size), dtype=jnp.float32)
    out_big = attack_regressor_forward(x_big, params)
    out_big = jax.block_until_ready(out_big)
    assert out_big.shape == (big_batch, output_size)
    ref_big = _ref_forward_bf16(x_big, w1, b1, w2, b2)
    assert jnp.allclose(out_big, ref_big, atol=1e-4, rtol=1e-4)

    print("KERNEL_OK")
</pallas_src>

<mosaic_0001>
module attributes {stable_mosaic.version = 11 : i64} {
  func.func @_attack_regressor_kernel(%arg0: i32, %arg1: memref<8x16xbf16, #tpu.memory_space<vmem>>, %arg2: memref<16x32xbf16, #tpu.memory_space<vmem>>, %arg3: memref<1x32xf32, #tpu.memory_space<vmem>>, %arg4: memref<32x1xbf16, #tpu.memory_space<vmem>>, %arg5: memref<1x1xf32, #tpu.memory_space<vmem>>, %arg6: memref<8x1xf32, #tpu.memory_space<vmem>>) attributes {dimension_semantics = [#tpu.dimension_semantics<parallel>], iteration_bounds = array<i64: 1>, scalar_prefetch = 0 : i64, scratch_operands = 0 : i64, tpu.core_type = #tpu.core_type<tc>, window_params = [{transform_indices = @transform_0, window_bounds = array<i64: 8, 16>}, {pipeline_mode = #tpu.pipeline_mode<synchronous>, transform_indices = @transform_1, window_bounds = array<i64: 16, 32>}, {pipeline_mode = #tpu.pipeline_mode<synchronous>, transform_indices = @transform_2, window_bounds = array<i64: 1, 32>}, {pipeline_mode = #tpu.pipeline_mode<synchronous>, transform_indices = @transform_3, window_bounds = array<i64: 32, 1>}, {pipeline_mode = #tpu.pipeline_mode<synchronous>, transform_indices = @transform_4, window_bounds = array<i64: 1, 1>}, {transform_indices = @transform_5, window_bounds = array<i64: 8, 1>}]} {
    %c0 = arith.constant 0 : index
    %c0_0 = arith.constant 0 : index
    %0 = vector.load %arg1[%c0, %c0_0] : memref<8x16xbf16, #tpu.memory_space<vmem>>, vector<8x16xbf16>
    %c0_1 = arith.constant 0 : index
    %c0_2 = arith.constant 0 : index
    %1 = vector.load %arg2[%c0_1, %c0_2] : memref<16x32xbf16, #tpu.memory_space<vmem>>, vector<16x32xbf16>
    %cst = arith.constant dense<0.000000e+00> : vector<8x32xf32>
    %2 = tpu.matmul %0, %1, %cst {dimension_numbers = #tpu.dot_dimension_numbers<[1], [0], [0], [1], [0, 0, 1, 1], [], []>} : vector<8x16xbf16>, vector<16x32xbf16>, vector<8x32xf32> -> vector<8x32xf32>
    %c0_3 = arith.constant 0 : index
    %c0_4 = arith.constant 0 : index
    %3 = vector.load %arg3[%c0_3, %c0_4] : memref<1x32xf32, #tpu.memory_space<vmem>>, vector<1x32xf32>
    %4 = vector.broadcast %3 : vector<1x32xf32> to vector<8x32xf32>
    %5 = arith.addf %2, %4 : vector<8x32xf32>
    %cst_5 = arith.constant 0.000000e+00 : f32
    %6 = vector.broadcast %cst_5 : f32 to vector<8x32xf32>
    %7 = arith.maximumf %5, %6 : vector<8x32xf32>
    %8 = arith.truncf %7 : vector<8x32xf32> to vector<8x32xbf16>
    %c0_6 = arith.constant 0 : index
    %c0_7 = arith.constant 0 : index
    %9 = vector.load %arg4[%c0_6, %c0_7] : memref<32x1xbf16, #tpu.memory_space<vmem>>, vector<32x1xbf16>
    %cst_8 = arith.constant dense<0.000000e+00> : vector<8x1xf32>
    %10 = tpu.matmul %8, %9, %cst_8 {dimension_numbers = #tpu.dot_dimension_numbers<[1], [0], [0], [1], [0, 0, 1, 1], [], []>} : vector<8x32xbf16>, vector<32x1xbf16>, vector<8x1xf32> -> vector<8x1xf32>
    %c0_9 = arith.constant 0 : index
    %c0_10 = arith.constant 0 : index
    %11 = vector.load %arg5[%c0_9, %c0_10] : memref<1x1xf32, #tpu.memory_space<vmem>>, vector<1x1xf32>
    %12 = vector.broadcast %11 : vector<1x1xf32> to vector<8x1xf32>
    %13 = arith.addf %10, %12 : vector<8x1xf32>
    %c0_11 = arith.constant 0 : index
    %c0_12 = arith.constant 0 : index
    %14 = vector.load %arg6[%c0_11, %c0_12] : memref<8x1xf32, #tpu.memory_space<vmem>>, vector<8x1xf32>
    tpu.vector_store %arg6[%c0_11, %c0_12], %13 {strides = array<i32>} : memref<8x1xf32, #tpu.memory_space<vmem>>, vector<8x1xf32>,
    return
  }
  func.func @transform_0(%arg0: i32) -> (i32, i32) {
    %c0_i32 = arith.constant 0 : i32
    %c0_i32_0 = arith.constant 0 : i32
    return %arg0, %c0_i32 : i32, i32
  }
  func.func @transform_1(%arg0: i32) -> (i32, i32) {
    %c0_i32 = arith.constant 0 : i32
    %c0_i32_0 = arith.constant 0 : i32
    %c0_i32_1 = arith.constant 0 : i32
    return %c0_i32, %c0_i32_0 : i32, i32
  }
  func.func @transform_2(%arg0: i32) -> (i32, i32) {
    %c0_i32 = arith.constant 0 : i32
    %c0_i32_0 = arith.constant 0 : i32
    %c0_i32_1 = arith.constant 0 : i32
    return %c0_i32, %c0_i32_0 : i32, i32
  }
  func.func @transform_3(%arg0: i32) -> (i32, i32) {
    %c0_i32 = arith.constant 0 : i32
    %c0_i32_0 = arith.constant 0 : i32
    %c0_i32_1 = arith.constant 0 : i32
    return %c0_i32, %c0_i32_0 : i32, i32
  }
  func.func @transform_4(%arg0: i32) -> (i32, i32) {
    %c0_i32 = arith.constant 0 : i32
    %c0_i32_0 = arith.constant 0 : i32
    %c0_i32_1 = arith.constant 0 : i32
    return %c0_i32, %c0_i32_0 : i32, i32
  }
  func.func @transform_5(%arg0: i32) -> (i32, i32) {
    %c0_i32 = arith.constant 0 : i32
    %c0_i32_0 = arith.constant 0 : i32
    return %arg0, %c0_i32 : i32, i32
  }
}

</mosaic_0001>

<bundles_post_ra>
// kernel: attack_regressor_forward.1
= control target key start
LH: loop header
LB: loop body
LE: loop exit
PB: predicated region body
PF: predicated region fallthrough
CT: control target
= control target key end

     0   :  { %v189_v0 = vmov 0.0   ;;  %vm190_vm0 = vmmov 0   ;;  %vm39_vm1 = vcmask 130048   ;;  %vm108_vm2 = vcmask 261120   ;;  %s242_s1 = inlined_call_operand.vmem [shape: bf16[16,32], index: 1, kind: input, shape index: {}]   ;;  %s243_s0 = inlined_call_operand.vmem [shape: bf16[8,16], index: 0, kind: input, shape index: {}]   ;;  %s244_s3 = inlined_call_operand.vmem [shape: bf16[32,1], index: 3, kind: input, shape index: {}]   ;;  %s245_s4 = inlined_call_operand.<no memory space> [shape: f32[1,1], index: 4, kind: input, shape index: {}]   ;;  %s246_s2 = inlined_call_operand.vmem [shape: f32[1,32], index: 2, kind: input, shape index: {}]   ;;  %s247_s5 = inlined_call_operand.vmem [shape: f32[8,1], index: 5, kind: output, shape index: {}]  }
   0x1   :  { %170 = vmatprep.subr.bf16.mxu0 %v189_v0  ;;  %v186_v1 = vld [vmem:[%s242_s1] sm:$0xff]   ;;  %172 = vmatprep.mubr.msk.bf16.mxu0 %vm190_vm0, %v189_v0  ;;  %v188_v4 = vld [vmem:[%s244_s3 + $0x8] sm:$0xff]   ;;  %v10_v5 = vstv %s245_s4  ;;  %vm152_vm3 = vcmask 7168  }
   0x2   :  { %176 = vmatprep.subr.bf16.mxu1 %v189_v0  ;;  %180 = vmatprep.mubr.msk.bf16.mxu1 %vm190_vm0, %v189_v0  ;;  %v23_v2 = vld [vmem:[%s243_s0] sm:$0xf]  ;;  %11 = vst [vmem:[#allocation2] sm:$0x1] %v10_v5 }
   0x3   :  { %171 = vmatpush3.bf16.msra.mxu0 %v186_v1  ;;  %v187_v3 = vld [vmem:[%s244_s3] sm:$0xff]  }
   0x4   :  { %177 = vmatpush3.bf16.msra.mxu1 %v187_v3  ;;  %v158_v6 = vld [vmem:[%s246_s2] ss:$0 sm:$0xff] }
   0x5   :  { %178 = vmatprep.subr.bf16.mxu1 %v189_v0 }
   0x6   :  { %173 = vmatmul.mubr.msk.bf16.vlgmr.msra.gmra.mrb[0].mxu0 %vm39_vm1, %v23_v2 }
   0x8   :  { %179 = vmatpush3.bf16.msra.mxu1 %v188_v4 }
   0x9   :  { %v161_v14 = vld [vmem:[#allocation2] ss:$0 sm:$0xff] }
  0xd9   :  { %v77_v7 = vpop.f32.mrb[0].mxu0 }
  0xda   :  { %v78_v8 = vadd.f32 %v158_v6, %v77_v7  ;;  %v174_v9 = vpop.f32.mrb[1].mxu0 }
  0xdb   :  { %v80_v10 = vpop.f32.mrb[2].mxu0 }
  0xdc   :  { %v83_v11 = vmax.f32 %v78_v8, 0.0  ;;  %v175_v12 = vpop.f32.mrb[3].mxu0 }
  0xde   :  { %v84_v13 = vpack.c.bf16 %v83_v11, %v83_v11 }
  0xe0   :  { %181 = vmatmul.mubr.msk.bf16.vlgmr.msra.gmra.mrb[0].mxu1 %vm108_vm2, %v84_v13 }
 0x1b3   :  { %v146_v15 = vpop.f32.mrb[0].mxu1 }
 0x1b4   :  { %v147_v16 = vadd.f32 %v161_v14, %v146_v15  ;;  %v182_v17 = vpop.f32.mrb[1].mxu1 }
 0x1b5   :  { %v149_v18 = vpop.f32.mrb[2].mxu1 }
 0x1b6   :  { %153 = vst.msk [vmem:[%s247_s5] sm:$0xff] %vm152_vm3, %v147_v16  ;;  %v183_v19 = vpop.f32.mrb[3].mxu1 }

</bundles_post_ra>
